<compile_context>
chip_gen: v6e
topology: v6e:2x2x1
jax: 0.10.0
libtpu: 0.0.40
codegen_flags: <defaults>
</compile_context>

<pallas_src>
import functools

import jax
import jax.numpy as jnp
from jax.experimental import pallas as pl
from jax.experimental.pallas import tpu as pltpu


# --------------------------- fused kernel ---------------------------
def _basic_block_kernel(x_ref, w1_ref, w2_ref, bias_ref, out_ref, *, Nb, H, WC):
    """Fused BasicBlock forward for Nb batch images (lane-folded layout)."""
    x = x_ref[...]                                          # (Nb, H, WC) f32

    def conv3x3_bn(a, w_ref, bias):
        # a: (Nb, H, WC) f32.  w_ref: (3*WC, WC) bf16 banded weight with the
        # BN scale pre-folded into its columns; row block kh holds the
        # horizontal taps of filter row kh (horizontal zero-pad implicit).
        z = jnp.zeros((Nb, 1, WC), jnp.float32)
        a_dn = jnp.concatenate([z, a[:, :H - 1]], axis=1)   # row h-1 (kh=0)
        a_up = jnp.concatenate([a[:, 1:], z], axis=1)       # row h+1 (kh=2)
        # Build the wide LHS directly in bf16; batch folds into the MXU M dim.
        lhs = jnp.concatenate(
            [a_dn.astype(jnp.bfloat16),
             a.astype(jnp.bfloat16),
             a_up.astype(jnp.bfloat16)], axis=2).reshape(Nb * H, 3 * WC)
        y = jnp.dot(lhs, w_ref[...],
                    preferred_element_type=jnp.float32)     # one MXU matmul
        return y.reshape(Nb, H, WC) + bias                  # BN bias only (f32)

    b1 = bias_ref[0:1, :]                                   # (1, WC), broadcasts
    b2 = bias_ref[1:2, :]

    h1 = jnp.maximum(conv3x3_bn(x, w1_ref, b1), 0.0)        # conv1+bn1+relu
    y = conv3x3_bn(h1, w2_ref, b2) + x                      # conv2+bn2+residual
    out_ref[...] = jnp.maximum(y, 0.0).astype(out_ref.dtype)  # relu


# ---------------------- one-time parameter prep ----------------------
def _bn_scale_bias(gamma, beta, mean, var, eps=1e-5):
    scale = gamma / jnp.sqrt(var + eps)
    return scale, beta - mean * scale


def _band_weight(w_hwio, W, scale):
    """(3, 3, Cin, Cout) HWIO -> (3*W*Cin, W*Cout) banded weight, BN-scale folded.

    Row block kh, entry [w_in*Cin + ci, w_out*Cout + co] = w[kh, kw, ci, co] *
    scale[co], with w_in = w_out + kw - 1; out-of-range w_in entries are
    absent, which implements the horizontal zero padding of conv3x3(pad=1).
    Done in f32; caller casts to bf16 afterwards.
    """
    w = w_hwio.astype(jnp.float32) * scale[None, None, None, :]
    mats = []
    for kh in range(3):
        m = sum(jnp.kron(jnp.eye(W, k=-(kw - 1), dtype=jnp.float32), w[kh, kw])
                for kw in range(3))
        mats.append(m)
    return jnp.concatenate(mats, axis=0)


def prepare_basic_block(p, W, eps=1e-5):
    """Hoisted, once-per-parameter-set preprocessing (keep out of hot path)."""
    s1, b1 = _bn_scale_bias(p["bn1_gamma"], p["bn1_beta"],
                            p["bn1_mean"], p["bn1_var"], eps)
    s2, b2 = _bn_scale_bias(p["bn2_gamma"], p["bn2_beta"],
                            p["bn2_mean"], p["bn2_var"], eps)
    return dict(
        w1b=_band_weight(p["w1"], W, s1).astype(jnp.bfloat16),   # (3*WC, WC)
        w2b=_band_weight(p["w2"], W, s2).astype(jnp.bfloat16),   # (3*WC, WC)
        # Per-lane (folded) bias rows for bn1 / bn2.
        bias=jnp.stack([jnp.tile(b1, W), jnp.tile(b2, W)]).astype(jnp.float32),
    )


# ----------------------------- forward -----------------------------
def _pick_nb(N, H, target_rows=256, min_rows=128):
    """Images per grid step so the matmul M dim (~Nb*H) fills the MXU rows."""
    cap = max(1, min(N, max(1, target_rows // max(H, 1))))
    nb = next(d for d in range(cap, 0, -1) if N % d == 0)
    # v7x megacore: prefer an even-length grid if that still keeps M >= min_rows.
    if N // nb == 1 and N > 1:
        for d in range(nb - 1, 0, -1):
            if N % d == 0 and (N // d) % 2 == 0 and d * H >= min_rows:
                return d
    return nb


@jax.jit
def basic_block(x, prep):
    """BasicBlock.forward (stride=1, downsample=None), x in NHWC f32."""
    N, H, W, C = x.shape
    WC = W * C
    Nb = _pick_nb(N, H)                       # static (shape-derived)

    xf = x.reshape(N, H, WC)                  # lane-dense folded activations

    out = pl.pallas_call(
        functools.partial(_basic_block_kernel, Nb=Nb, H=H, WC=WC),
        out_shape=jax.ShapeDtypeStruct((N, H, WC), x.dtype),
        grid=(N // Nb,),
        in_specs=[
            pl.BlockSpec((Nb, H, WC), lambda n: (n, 0, 0)),   # activations
            pl.BlockSpec((3 * WC, WC), lambda n: (0, 0)),     # conv1 weight (scale-folded)
            pl.BlockSpec((3 * WC, WC), lambda n: (0, 0)),     # conv2 weight (scale-folded)
            pl.BlockSpec((2, WC), lambda n: (0, 0)),          # bn1/bn2 bias rows
        ],
        out_specs=pl.BlockSpec((Nb, H, WC), lambda n: (n, 0, 0)),
        compiler_params=pltpu.CompilerParams(
            dimension_semantics=("parallel",)),
    )(xf, prep["w1b"], prep["w2b"], prep["bias"])
    return out.reshape(N, H, W, C)


# ----------------- pure-JAX reference (for checking) -----------------
def _ref_conv_bn(x, w, scale, bias):
    y = jax.lax.conv_general_dilated(
        x, w, window_strides=(1, 1), padding=((1, 1), (1, 1)),
        dimension_numbers=("NHWC", "HWIO", "NHWC"),
        precision=jax.lax.Precision.HIGHEST)
    return y * scale + bias


def reference_basic_block(x, p):
    s1, b1 = _bn_scale_bias(p["bn1_gamma"], p["bn1_beta"],
                            p["bn1_mean"], p["bn1_var"])
    out = jnp.maximum(_ref_conv_bn(x, p["w1"], s1, b1), 0.0)
    s2, b2 = _bn_scale_bias(p["bn2_gamma"], p["bn2_beta"],
                            p["bn2_mean"], p["bn2_var"])
    out = jnp.maximum(_ref_conv_bn(out, p["w2"], s2, b2) + x, 0.0)
    return out


if __name__ == "__main__":
    key = jax.random.PRNGKey(0)
    N, C, H, W = 2, 8, 16, 16        # inplanes = planes = 8 (expansion = 1)
    k = jax.random.split(key, 8)

    # NHWC input (equivalent PyTorch input would be NCHW (2, 8, 16, 16)).
    x = jax.random.normal(k[0], (N, H, W, C), jnp.float32)

    params = dict(
        w1=0.1 * jax.random.normal(k[1], (3, 3, C, C), jnp.float32),
        w2=0.1 * jax.random.normal(k[2], (3, 3, C, C), jnp.float32),
        bn1_gamma=1.0 + 0.1 * jax.random.normal(k[3], (C,), jnp.float32),
        bn1_beta=0.1 * jax.random.normal(k[4], (C,), jnp.float32),
        bn1_mean=jnp.zeros((C,), jnp.float32),
        bn1_var=jnp.ones((C,), jnp.float32),
        bn2_gamma=1.0 + 0.1 * jax.random.normal(k[5], (C,), jnp.float32),
        bn2_beta=0.1 * jax.random.normal(k[6], (C,), jnp.float32),
        bn2_mean=jnp.zeros((C,), jnp.float32),
        bn2_var=jnp.ones((C,), jnp.float32),
    )

    prep = prepare_basic_block(params, W)            # one-time, off the hot path
    out = jax.block_until_ready(basic_block(x, prep))
    ref = jax.block_until_ready(reference_basic_block(x, params))

    assert out.shape == (N, H, W, C), out.shape
    assert bool(jnp.all(jnp.isfinite(out)))
    # bf16 MXU operands vs f32 HIGHEST reference -> ~1e-2 scale differences.
    assert bool(jnp.allclose(out, ref, rtol=5e-2, atol=5e-2)), (
        float(jnp.max(jnp.abs(out - ref))))

    print("KERNEL_OK")
</pallas_src>

<mosaic_0001>
module attributes {stable_mosaic.version = 11 : i64} {
  func.func @_basic_block_kernel(%arg0: i32, %arg1: memref<2x16x128xf32, #tpu.memory_space<vmem>>, %arg2: memref<384x128xbf16, #tpu.memory_space<vmem>>, %arg3: memref<384x128xbf16, #tpu.memory_space<vmem>>, %arg4: memref<2x128xf32, #tpu.memory_space<vmem>>, %arg5: memref<2x16x128xf32, #tpu.memory_space<vmem>>) attributes {dimension_semantics = [#tpu.dimension_semantics<parallel>], iteration_bounds = array<i64: 1>, scalar_prefetch = 0 : i64, scratch_operands = 0 : i64, tpu.core_type = #tpu.core_type<tc>, window_params = [{transform_indices = @transform_0, window_bounds = array<i64: 2, 16, 128>}, {pipeline_mode = #tpu.pipeline_mode<synchronous>, transform_indices = @transform_1, window_bounds = array<i64: 384, 128>}, {pipeline_mode = #tpu.pipeline_mode<synchronous>, transform_indices = @transform_2, window_bounds = array<i64: 384, 128>}, {pipeline_mode = #tpu.pipeline_mode<synchronous>, transform_indices = @transform_3, window_bounds = array<i64: 2, 128>}, {transform_indices = @transform_4, window_bounds = array<i64: 2, 16, 128>}]} {
    %c0 = arith.constant 0 : index
    %c0_0 = arith.constant 0 : index
    %c0_1 = arith.constant 0 : index
    %0 = vector.load %arg1[%c0, %c0_0, %c0_1] : memref<2x16x128xf32, #tpu.memory_space<vmem>>, vector<2x16x128xf32>
    %c0_2 = arith.constant 0 : index
    %c0_3 = arith.constant 0 : index
    %1 = vector.load %arg4[%c0_2, %c0_3] : memref<2x128xf32, #tpu.memory_space<vmem>>, vector<1x128xf32>
    %c1 = arith.constant 1 : index
    %c0_4 = arith.constant 0 : index
    %2 = vector.load %arg4[%c1, %c0_4] : memref<2x128xf32, #tpu.memory_space<vmem>>, vector<1x128xf32>
    %cst = arith.constant 0.000000e+00 : f32
    %3 = vector.broadcast %cst : f32 to vector<2x1x128xf32>
    %4 = vector.extract_strided_slice %0 {offsets = [0, 0, 0], sizes = [2, 15, 128], strides = [1, 1, 1]} : vector<2x16x128xf32> to vector<2x15x128xf32>
    %5 = tpu.concatenate %3, %4 in 1 : vector<2x1x128xf32>, vector<2x15x128xf32> -> vector<2x16x128xf32>
    %6 = vector.extract_strided_slice %0 {offsets = [0, 1, 0], sizes = [2, 15, 128], strides = [1, 1, 1]} : vector<2x16x128xf32> to vector<2x15x128xf32>
    %7 = tpu.concatenate %6, %3 in 1 : vector<2x15x128xf32>, vector<2x1x128xf32> -> vector<2x16x128xf32>
    %8 = arith.truncf %5 : vector<2x16x128xf32> to vector<2x16x128xbf16>
    %9 = arith.truncf %0 : vector<2x16x128xf32> to vector<2x16x128xbf16>
    %10 = arith.truncf %7 : vector<2x16x128xf32> to vector<2x16x128xbf16>
    %11 = tpu.concatenate %8, %9, %10 in 2 : vector<2x16x128xbf16>, vector<2x16x128xbf16>, vector<2x16x128xbf16> -> vector<2x16x384xbf16>
    %12 = vector.shape_cast %11 : vector<2x16x384xbf16> to vector<32x384xbf16>
    %c0_5 = arith.constant 0 : index
    %c0_6 = arith.constant 0 : index
    %13 = vector.load %arg2[%c0_5, %c0_6] : memref<384x128xbf16, #tpu.memory_space<vmem>>, vector<384x128xbf16>
    %cst_7 = arith.constant dense<0.000000e+00> : vector<32x128xf32>
    %14 = tpu.matmul %12, %13, %cst_7 {dimension_numbers = #tpu.dot_dimension_numbers<[1], [0], [0], [1], [0, 0, 1, 1], [], []>} : vector<32x384xbf16>, vector<384x128xbf16>, vector<32x128xf32> -> vector<32x128xf32>
    %15 = vector.shape_cast %14 : vector<32x128xf32> to vector<2x16x128xf32>
    %16 = vector.shape_cast %1 : vector<1x128xf32> to vector<1x1x128xf32>
    %17 = vector.broadcast %16 : vector<1x1x128xf32> to vector<2x16x128xf32>
    %18 = arith.addf %15, %17 : vector<2x16x128xf32>
    %cst_8 = arith.constant 0.000000e+00 : f32
    %19 = vector.broadcast %cst_8 : f32 to vector<2x16x128xf32>
    %20 = arith.maximumf %18, %19 : vector<2x16x128xf32>
    %cst_9 = arith.constant 0.000000e+00 : f32
    %21 = vector.broadcast %cst_9 : f32 to vector<2x1x128xf32>
    %22 = vector.extract_strided_slice %20 {offsets = [0, 0, 0], sizes = [2, 15, 128], strides = [1, 1, 1]} : vector<2x16x128xf32> to vector<2x15x128xf32>
    %23 = tpu.concatenate %21, %22 in 1 : vector<2x1x128xf32>, vector<2x15x128xf32> -> vector<2x16x128xf32>
    %24 = vector.extract_strided_slice %20 {offsets = [0, 1, 0], sizes = [2, 15, 128], strides = [1, 1, 1]} : vector<2x16x128xf32> to vector<2x15x128xf32>
    %25 = tpu.concatenate %24, %21 in 1 : vector<2x15x128xf32>, vector<2x1x128xf32> -> vector<2x16x128xf32>
    %26 = arith.truncf %23 : vector<2x16x128xf32> to vector<2x16x128xbf16>
    %27 = arith.truncf %20 : vector<2x16x128xf32> to vector<2x16x128xbf16>
    %28 = arith.truncf %25 : vector<2x16x128xf32> to vector<2x16x128xbf16>
    %29 = tpu.concatenate %26, %27, %28 in 2 : vector<2x16x128xbf16>, vector<2x16x128xbf16>, vector<2x16x128xbf16> -> vector<2x16x384xbf16>
    %30 = vector.shape_cast %29 : vector<2x16x384xbf16> to vector<32x384xbf16>
    %c0_10 = arith.constant 0 : index
    %c0_11 = arith.constant 0 : index
    %31 = vector.load %arg3[%c0_10, %c0_11] : memref<384x128xbf16, #tpu.memory_space<vmem>>, vector<384x128xbf16>
    %cst_12 = arith.constant dense<0.000000e+00> : vector<32x128xf32>
    %32 = tpu.matmul %30, %31, %cst_12 {dimension_numbers = #tpu.dot_dimension_numbers<[1], [0], [0], [1], [0, 0, 1, 1], [], []>} : vector<32x384xbf16>, vector<384x128xbf16>, vector<32x128xf32> -> vector<32x128xf32>
    %33 = vector.shape_cast %32 : vector<32x128xf32> to vector<2x16x128xf32>
    %34 = vector.shape_cast %2 : vector<1x128xf32> to vector<1x1x128xf32>
    %35 = vector.broadcast %34 : vector<1x1x128xf32> to vector<2x16x128xf32>
    %36 = arith.addf %33, %35 : vector<2x16x128xf32>
    %37 = arith.addf %36, %0 : vector<2x16x128xf32>
    %cst_13 = arith.constant 0.000000e+00 : f32
    %38 = vector.broadcast %cst_13 : f32 to vector<2x16x128xf32>
    %39 = arith.maximumf %37, %38 : vector<2x16x128xf32>
    %c0_14 = arith.constant 0 : index
    %c0_15 = arith.constant 0 : index
    %c0_16 = arith.constant 0 : index
    %40 = vector.load %arg5[%c0_14, %c0_15, %c0_16] : memref<2x16x128xf32, #tpu.memory_space<vmem>>, vector<2x16x128xf32>
    tpu.vector_store %arg5[%c0_14, %c0_15, %c0_16], %39 {strides = array<i32>} : memref<2x16x128xf32, #tpu.memory_space<vmem>>, vector<2x16x128xf32>,
    return
  }
  func.func @transform_0(%arg0: i32) -> (i32, i32, i32) {
    %c0_i32 = arith.constant 0 : i32
    %c0_i32_0 = arith.constant 0 : i32
    %c0_i32_1 = arith.constant 0 : i32
    return %arg0, %c0_i32, %c0_i32_0 : i32, i32, i32
  }
  func.func @transform_1(%arg0: i32) -> (i32, i32) {
    %c0_i32 = arith.constant 0 : i32
    %c0_i32_0 = arith.constant 0 : i32
    %c0_i32_1 = arith.constant 0 : i32
    return %c0_i32, %c0_i32_0 : i32, i32
  }
  func.func @transform_2(%arg0: i32) -> (i32, i32) {
    %c0_i32 = arith.constant 0 : i32
    %c0_i32_0 = arith.constant 0 : i32
    %c0_i32_1 = arith.constant 0 : i32
    return %c0_i32, %c0_i32_0 : i32, i32
  }
  func.func @transform_3(%arg0: i32) -> (i32, i32) {
    %c0_i32 = arith.constant 0 : i32
    %c0_i32_0 = arith.constant 0 : i32
    %c0_i32_1 = arith.constant 0 : i32
    return %c0_i32, %c0_i32_0 : i32, i32
  }
  func.func @transform_4(%arg0: i32) -> (i32, i32, i32) {
    %c0_i32 = arith.constant 0 : i32
    %c0_i32_0 = arith.constant 0 : i32
    %c0_i32_1 = arith.constant 0 : i32
    return %arg0, %c0_i32, %c0_i32_0 : i32, i32, i32
  }
}

</mosaic_0001>

<bundles_post_ra>
// kernel: basic_block.1
= control target key start
LH: loop header
LB: loop body
LE: loop exit
PB: predicated region body
PF: predicated region fallthrough
CT: control target
= control target key end

     0   :  { %vm41_vm0 = vcmask 1046528   ;;  %vm28_vm1 = vcmask 1040384   ;;  %vm953_vm3 = vmmov 1   ;;  %s1211_s1 = inlined_call_operand.vmem [shape: bf16[384,128], index: 1, kind: input, shape index: {}]   ;;  %s1212_s0 = inlined_call_operand.vmem [shape: f32[2,16,128], index: 0, kind: input, shape index: {}]   ;;  %s1213_s2 = inlined_call_operand.vmem [shape: bf16[384,128], index: 2, kind: input, shape index: {}]   ;;  %s1214_s3 = inlined_call_operand.vmem [shape: f32[2,128], index: 3, kind: input, shape index: {}]   ;;  %s1215_s4 = inlined_call_operand.vmem [shape: f32[2,16,128], index: 4, kind: output, shape index: {}]  }
   0x1   :  { %v905_v0 = vld [vmem:[%s1211_s1 + $0x78] sm:$0xff]   ;;  %v908_v3 = vld [vmem:[%s1211_s1 + $0x70] sm:$0xff]   ;;  %v911_v6 = vld [vmem:[%s1211_s1 + $0x68] sm:$0xff]  }
   0x2   :  { %v906_v1 = vld [vmem:[%s1211_s1 + $0xb8] sm:$0xff]   ;;  %788 = vmatprep.subr.bf16.mxu0 %v905_v0  ;;  %v909_v4 = vld [vmem:[%s1211_s1 + $0xb0] sm:$0xff]   ;;  %v912_v7 = vld [vmem:[%s1211_s1 + $0xa8] sm:$0xff]  }
   0x3   :  { %v907_v2 = vld [vmem:[%s1211_s1 + $0x38] sm:$0xff]   ;;  %864 = vmatprep.subr.bf16.mxu1 %v906_v1  ;;  %v910_v5 = vld [vmem:[%s1211_s1 + $0x30] sm:$0xff]   ;;  %v913_v8 = vld [vmem:[%s1211_s1 + $0x28] sm:$0xff]  }
   0x4   :  { %789 = vmatpush3.bf16.msra.mxu0 %v907_v2  ;;  %865 = vmatpush3.bf16.msra.mxu1 %v906_v1  ;;  %v914_v9 = vld [vmem:[%s1211_s1 + $0x60] sm:$0xff]   ;;  %v917_v12 = vld [vmem:[%s1211_s1 + $0x58] sm:$0xff]   ;;  %v920_v15 = vld [vmem:[%s1211_s1 + $0x50] sm:$0xff]  }
   0x5   :  { %790 = vmatprep.subr.bf16.mxu0 %v908_v3  ;;  %866 = vmatprep.subr.bf16.mxu1 %v909_v4  ;;  %v915_v10 = vld [vmem:[%s1211_s1 + $0xa0] sm:$0xff]   ;;  %v918_v13 = vld [vmem:[%s1211_s1 + $0x98] sm:$0xff]   ;;  %v921_v16 = vld [vmem:[%s1211_s1 + $0x90] sm:$0xff]  }
   0x6   :  { %v916_v11 = vld [vmem:[%s1211_s1 + $0x20] sm:$0xff]   ;;  %v919_v14 = vld [vmem:[%s1211_s1 + $0x18] sm:$0xff]   ;;  %v922_v17 = vld [vmem:[%s1211_s1 + $0x10] sm:$0xff]  }
   0x7   :  { %v923_v18 = vld [vmem:[%s1211_s1 + $0x48] sm:$0xff]   ;;  %v926_v21 = vld [vmem:[%s1211_s1 + $0x40] sm:$0xff]   ;;  %v1061_v25 = vld [vmem:[%s1212_s0 + $0x10] sm:$0xff] }
   0x8   :  { %791 = vmatpush3.bf16.msra.mxu0 %v910_v5  ;;  %867 = vmatpush3.bf16.msra.mxu1 %v909_v4  ;;  %v924_v19 = vld [vmem:[%s1211_s1 + $0x88] sm:$0xff]   ;;  %v927_v22 = vld [vmem:[%s1211_s1 + $0x80] sm:$0xff]   ;;  %v1066_v26 = vld [vmem:[%s1212_s0 + $0x18] sm:$0xff]  ;;  %v45_v33 = vrot.slane %v1061_v25, 1  ;;  %v32_v44 = vrot.slane %v1061_v25, 7 }
   0x9   :  { %792 = vmatprep.subr.bf16.mxu0 %v911_v6  ;;  %868 = vmatprep.subr.bf16.mxu1 %v912_v7  ;;  %v925_v20 = vld [vmem:[%s1211_s1 + $0x8] sm:$0xff]   ;;  %v1051_v23 = vld [vmem:[%s1212_s0] sm:$0xff]  ;;  %v46_v34 = vrot.slane %v1066_v26, 1  ;;  %vm734_vm2 = vmneg %vm28_vm1  ;;  %v57_v46 = vpack.c.bf16 %v1066_v26, %v1061_v25  ;;  %v33_v47 = vrot.slane %v1066_v26, 7 }
   0xa   :  { %v1056_v24 = vld [vmem:[%s1212_s0 + $0x8] sm:$0xff]  ;;  %v29_v27 = vrot.slane %v1051_v23, 7  ;;  %v42_v30 = vrot.slane %v1051_v23, 1  ;;  %v928_v31 = vld [vmem:[%s1211_s1] sm:$0xff]   ;;  %vm1082_vm4 = vmpackc.low %vm41_vm0, %vm953_vm3 }
   0xb   :  { %v30_v28 = vrot.slane %v1056_v24, 7  ;;  %v56_v29 = vpack.c.bf16 %v1056_v24, %v1051_v23  ;;  %v43_v32 = vrot.slane %v1056_v24, 1  ;;  %v47_v38 = vsel %vm41_vm0, %v45_v33, %v46_v34  ;;  %v929_v40 = vld [vmem:[%s1213_s2 + $0x78] sm:$0xff]   ;;  %vm1091_vm5 = vmpackc.low %vm953_vm3, %vm734_vm2  ;;  %v931_v49 = vld [vmem:[%s1213_s2 + $0x70] sm:$0xff]  }
   0xc   :  { %793 = vmatpush3.bf16.msra.mxu0 %v913_v8  ;;  %869 = vmatpush3.bf16.msra.mxu1 %v912_v7  ;;  %v746_v43 = vpack.c.bf16 %v46_v34, %v47_v38  ;;  %v930_v45 = vld [vmem:[%s1213_s2 + $0x38] sm:$0xff]   ;;  %v932_v50 = vld [vmem:[%s1213_s2 + $0x30] sm:$0xff]   ;;  %v933_v51 = vld [vmem:[%s1213_s2 + $0x68] sm:$0xff]   ;;  %v34_v52 = vsel %vm28_vm1, %v32_v44, %v33_v47 }
   0xd   :  { %794 = vmatprep.subr.bf16.mxu0 %v914_v9  ;;  %870 = vmatprep.subr.bf16.mxu1 %v915_v10  ;;  %v44_v35 = vsel %vm41_vm0, %v42_v30, %v43_v32  ;;  %v31_v37 = vsel %vm28_vm1, %v29_v27, %v30_v28  ;;  %v934_v48 = vld [vmem:[%s1213_s2 + $0xb8] sm:$0xff]   ;;  %v935_v53 = vld [vmem:[%s1213_s2 + $0x28] sm:$0xff]   ;;  %v740_v54 = vpack.c.bf16 %v34_v52, %v32_v44  ;;  %v936_v55 = vld [vmem:[%s1213_s2 + $0x60] sm:$0xff]  }
   0xe   :  { %284 = vmatprep.mubr.bf16.mxu0 %v56_v29  ;;  %v743_v39 = vpack.c.bf16 %v43_v32, %v44_v35  ;;  %v736_v42 = vpack.c.bf16 %v31_v37, %v29_v27  ;;  %v937_v56 = vld [vmem:[%s1213_s2 + $0xb0] sm:$0xff]   ;;  %v938_v57 = vld [vmem:[%s1213_s2 + $0x20] sm:$0xff]   ;;  %v939_v58 = vld [vmem:[%s1213_s2 + $0x58] sm:$0xff]  }
   0xf   :  { %v940_v59 = vld [vmem:[%s1213_s2 + $0xa8] sm:$0xff]   ;;  %v941_v60 = vld [vmem:[%s1213_s2 + $0x18] sm:$0xff]   ;;  %v942_v61 = vld [vmem:[%s1213_s2 + $0x50] sm:$0xff]  }
  0x10   :  { %795 = vmatpush3.bf16.msra.mxu0 %v916_v11  ;;  %871 = vmatpush3.bf16.msra.mxu1 %v915_v10  ;;  %v943_v62 = vld [vmem:[%s1213_s2 + $0xa0] sm:$0xff]   ;;  %v944_v63 = vld [vmem:[%s1213_s2 + $0x10] sm:$0xff]   ;;  %v945_v0 = vld [vmem:[%s1213_s2 + $0x48] sm:$0xff]  }
  0x11   :  { %796 = vmatprep.subr.bf16.mxu0 %v917_v12  ;;  %872 = vmatprep.subr.bf16.mxu1 %v918_v13  ;;  %v946_v1 = vld [vmem:[%s1213_s2 + $0x98] sm:$0xff]   ;;  %v947_v2 = vld [vmem:[%s1213_s2 + $0x8] sm:$0xff]   ;;  %v948_v3 = vld [vmem:[%s1213_s2 + $0x40] sm:$0xff]  }
  0x12   :  { %880 = vmatprep.mubr.msk.bf16.mxu1 %vm1082_vm4, %v743_v39  ;;  %v949_v4 = vld [vmem:[%s1213_s2 + $0x90] sm:$0xff]   ;;  %v950_v5 = vld [vmem:[%s1213_s2] sm:$0xff]   ;;  %v951_v6 = vld [vmem:[%s1213_s2 + $0x88] sm:$0xff]  }
  0x13   :  { %v952_v7 = vld [vmem:[%s1213_s2 + $0x80] sm:$0xff]  }
  0x14   :  { %797 = vmatpush3.bf16.msra.mxu0 %v919_v14  ;;  %873 = vmatpush3.bf16.msra.mxu1 %v918_v13  ;;  %v748_v13 = vld [vmem:[%s1214_s3] ss:$0 sm:$0xff] }
  0x15   :  { %798 = vmatprep.subr.bf16.mxu0 %v920_v15  ;;  %874 = vmatprep.subr.bf16.mxu1 %v921_v16 }
  0x18   :  { %799 = vmatpush3.bf16.msra.mxu0 %v922_v17  ;;  %875 = vmatpush3.bf16.msra.mxu1 %v921_v16 }
  0x19   :  { %800 = vmatprep.subr.bf16.mxu0 %v923_v18  ;;  %876 = vmatprep.subr.bf16.mxu1 %v924_v19 }
  0x1c   :  { %801 = vmatpush3.bf16.msra.mxu0 %v925_v20  ;;  %877 = vmatpush3.bf16.msra.mxu1 %v924_v19 }
  0x1d   :  { %802 = vmatprep.subr.bf16.mxu0 %v926_v21  ;;  %878 = vmatprep.subr.bf16.mxu1 %v927_v22 }
  0x20   :  { %803 = vmatpush3.bf16.msra.mxu0 %v928_v31  ;;  %879 = vmatpush3.bf16.msra.mxu1 %v927_v22 }
  0x21   :  { %826 = vmatprep.subr.bf16.mxu0 %v929_v40  ;;  %884 = vmatprep.subr.bf16.mxu1 %v934_v48 }
  0x23   :  { %737 = vmatmul.mubr.msk.bf16.vlgmr.msra.gmra.mxu0 %vm1091_vm5, %v736_v42  ;;  %881 = vmatmul.mubr.msk.bf16.vlgmr.msra.gmra.mxu1 %vm1082_vm4, %v746_v43 }
  0x24   :  { %292 = vmatprep.mubr.bf16.mxu0 %v57_v46  ;;  %827 = vmatpush3.bf16.msra.mxu0 %v930_v45 }
  0x25   :  { %828 = vmatprep.subr.bf16.mxu0 %v931_v49  ;;  %885 = vmatpush3.bf16.msra.mxu1 %v934_v48 }
  0x26   :  { %886 = vmatprep.subr.bf16.mxu1 %v937_v56 }
  0x28   :  { %829 = vmatpush3.bf16.msra.mxu0 %v932_v50 }
  0x29   :  { %830 = vmatprep.subr.bf16.mxu0 %v933_v51  ;;  %887 = vmatpush3.bf16.msra.mxu1 %v937_v56 }
  0x2a   :  { %888 = vmatprep.subr.bf16.mxu1 %v940_v59 }
  0x2b   :  { %741 = vmatmul.mubr.msk.bf16.gmra.mxu0 %vm1091_vm5, %v740_v54 }
  0x2c   :  { %831 = vmatpush3.bf16.msra.mxu0 %v935_v53 }
  0x2d   :  { %832 = vmatprep.subr.bf16.mxu0 %v936_v55  ;;  %889 = vmatpush3.bf16.msra.mxu1 %v940_v59 }
  0x2e   :  { %890 = vmatprep.subr.bf16.mxu1 %v943_v62 }
  0x30   :  { %833 = vmatpush3.bf16.msra.mxu0 %v938_v57 }
  0x31   :  { %834 = vmatprep.subr.bf16.mxu0 %v939_v58  ;;  %891 = vmatpush3.bf16.msra.mxu1 %v943_v62 }
  0x32   :  { %892 = vmatprep.subr.bf16.mxu1 %v946_v1 }
  0x34   :  { %835 = vmatpush3.bf16.msra.mxu0 %v941_v60 }
  0x35   :  { %836 = vmatprep.subr.bf16.mxu0 %v942_v61  ;;  %893 = vmatpush3.bf16.msra.mxu1 %v946_v1 }
  0x36   :  { %894 = vmatprep.subr.bf16.mxu1 %v949_v4 }
  0x38   :  { %837 = vmatpush3.bf16.msra.mxu0 %v944_v63 }
  0x39   :  { %838 = vmatprep.subr.bf16.mxu0 %v945_v0  ;;  %895 = vmatpush3.bf16.msra.mxu1 %v949_v4  ;;  %v787_v4 = vld [vmem:[%s1214_s3 + $0x1] ss:$0 sm:$0xff] }
  0x3a   :  { %896 = vmatprep.subr.bf16.mxu1 %v951_v6 }
  0x3c   :  { %839 = vmatpush3.bf16.msra.mxu0 %v947_v2 }
  0x3d   :  { %840 = vmatprep.subr.bf16.mxu0 %v948_v3  ;;  %897 = vmatpush3.bf16.msra.mxu1 %v951_v6 }
  0x3e   :  { %898 = vmatprep.subr.bf16.mxu1 %v952_v7 }
  0x40   :  { %841 = vmatpush3.bf16.msra.mxu0 %v950_v5 }
  0x41   :  { %899 = vmatpush3.bf16.msra.mxu1 %v952_v7 }
  0xe3   :  { %v804_v8 = vpop.f32.mrf.mxu0  ;;  %v882_v9 = vpop.f32.mrf.mxu1 }
  0xe5   :  { %v805_v10 = vpop.f32.mrf.mxu0  ;;  %v335_v11 = vpop.f32.mrf.mxu1 }
  0xe6   :  { %v806_v12 = vadd.f32 %v805_v10, %v804_v8 }
  0xe7   :  { %v807_v14 = vpop.f32.mrf.mxu0  ;;  %v883_v15 = vpop.f32.mrf.mxu1 }
  0xe8   :  { %v336_v16 = vadd.f32 %v806_v12, %v335_v11 }
  0xe9   :  { %v808_v17 = vpop.f32.mrf.mxu0  ;;  %v338_v20 = vpop.f32.mrf.mxu1 }
  0xea   :  { %v354_v18 = vadd.f32 %v748_v13, %v336_v16  ;;  %v809_v19 = vadd.f32 %v808_v17, %v807_v14 }
  0xeb   :  { %v810_v21 = vpop.f32.mrf.mxu0 }
  0xec   :  { %v339_v22 = vadd.f32 %v809_v19, %v338_v20  ;;  %v358_v27 = vmax.f32 %v354_v18, 0.0 }
  0xed   :  { %v811_v28 = vpop.f32.mrf.mxu0 }
  0xee   :  { %v355_v29 = vadd.f32 %v748_v13, %v339_v22  ;;  %v812_v30 = vadd.f32 %v811_v28, %v810_v21  ;;  %v366_v34 = vrot.slane %v358_v27, 7  ;;  %v378_v35 = vrot.slane %v358_v27, 1 }
  0xef   :  { %v813_v31 = vpop.f32.mrf.mxu0 }
  0xf0   :  { %v359_v32 = vmax.f32 %v355_v29, 0.0  ;;  %v344_v33 = vadd.f32 %v882_v9, %v812_v30 }
  0xf1   :  { %v814_v37 = vpop.f32.mrf.mxu0 }
  0xf2   :  { %v367_v38 = vrot.slane %v359_v32, 7  ;;  %v379_v39 = vrot.slane %v359_v32, 1  ;;  %v356_v40 = vadd.f32 %v748_v13, %v344_v33  ;;  %v815_v42 = vadd.f32 %v814_v37, %v813_v31 }
  0xf3   :  { %v392_v43 = vpack.c.bf16 %v359_v32, %v358_v27 }
  0xf4   :  { %v368_v44 = vsel %vm28_vm1, %v366_v34, %v367_v38  ;;  %v347_v45 = vadd.f32 %v883_v15, %v815_v42  ;;  %v380_v46 = vsel %vm41_vm0, %v378_v35, %v379_v39  ;;  %v360_v48 = vmax.f32 %v356_v40, 0.0 }
  0xf5   :  { %v775_v47 = vpack.c.bf16 %v368_v44, %v366_v34  ;;  %620 = vmatprep.mubr.bf16.mxu0 %v392_v43  ;;  %v782_v49 = vpack.c.bf16 %v379_v39, %v380_v46 }
  0xf6   :  { %v357_v50 = vadd.f32 %v748_v13, %v347_v45  ;;  %v381_v52 = vrot.slane %v360_v48, 1  ;;  %v369_v56 = vrot.slane %v360_v48, 7 }
  0xf7   :  { %776 = vmatmul.mubr.msk.bf16.vlgmr.msra.gmra.mxu0 %vm1091_vm5, %v775_v47  ;;  %900 = vmatprep.mubr.msk.bf16.mxu1 %vm1082_vm4, %v782_v49 }
  0xf8   :  { %v361_v51 = vmax.f32 %v357_v50, 0.0 }
  0xfa   :  { %v370_v53 = vrot.slane %v361_v51, 7  ;;  %v382_v54 = vrot.slane %v361_v51, 1  ;;  %v393_v55 = vpack.c.bf16 %v361_v51, %v360_v48 }
  0xfc   :  { %v383_v57 = vsel %vm41_vm0, %v381_v52, %v382_v54  ;;  %628 = vmatprep.mubr.bf16.mxu0 %v393_v55  ;;  %v371_v58 = vsel %vm28_vm1, %v369_v56, %v370_v53 }
  0xfd   :  { %v785_v59 = vpack.c.bf16 %v382_v54, %v383_v57  ;;  %v779_v60 = vpack.c.bf16 %v371_v58, %v369_v56 }
  0xff   :  { %780 = vmatmul.mubr.msk.bf16.gmra.mxu0 %vm1091_vm5, %v779_v60  ;;  %901 = vmatmul.mubr.msk.bf16.vlgmr.msra.gmra.mxu1 %vm1082_vm4, %v785_v59 }
 0x1b7   :  { %v842_v61 = vpop.f32.mrf.mxu0 }
 0x1b9   :  { %v843_v62 = vpop.f32.mrf.mxu0 }
 0x1ba   :  { %v844_v3 = vadd.f32 %v843_v62, %v842_v61 }
 0x1bb   :  { %v845_v63 = vpop.f32.mrf.mxu0 }
 0x1bd   :  { %v846_v0 = vpop.f32.mrf.mxu0 }
 0x1be   :  { %v847_v10 = vadd.f32 %v846_v0, %v845_v63 }
 0x1bf   :  { %v848_v1 = vpop.f32.mrf.mxu0  ;;  %v902_v2 = vpop.f32.mrf.mxu1 }
 0x1c1   :  { %v849_v5 = vpop.f32.mrf.mxu0  ;;  %v671_v6 = vpop.f32.mrf.mxu1 }
 0x1c2   :  { %v850_v7 = vadd.f32 %v849_v5, %v848_v1  ;;  %v672_v8 = vadd.f32 %v844_v3, %v671_v6 }
 0x1c3   :  { %v851_v41 = vpop.f32.mrf.mxu0  ;;  %v903_v9 = vpop.f32.mrf.mxu1 }
 0x1c4   :  { %v680_v36 = vadd.f32 %v902_v2, %v850_v7  ;;  %v690_v11 = vadd.f32 %v787_v4, %v672_v8 }
 0x1c5   :  { %v852_v12 = vpop.f32.mrf.mxu0  ;;  %v674_v13 = vpop.f32.mrf.mxu1 }
 0x1c6   :  { %v692_v14 = vadd.f32 %v787_v4, %v680_v36  ;;  %v694_v15 = vadd.f32 %v690_v11, %v1051_v23  ;;  %v853_v16 = vadd.f32 %v852_v12, %v851_v41  ;;  %v675_v17 = vadd.f32 %v847_v10, %v674_v13 }
 0x1c8   :  { %v696_v18 = vadd.f32 %v692_v14, %v1061_v25  ;;  %v698_v19 = vmax.f32 %v694_v15, 0.0  ;;  %v683_v20 = vadd.f32 %v903_v9, %v853_v16  ;;  %v691_v21 = vadd.f32 %v787_v4, %v675_v17 }
 0x1ca   :  { %v700_v22 = vmax.f32 %v696_v18, 0.0  ;;  %702 = vst [vmem:[%s1215_s4] sm:$0xff] %v698_v19  ;;  %v693_v27 = vadd.f32 %v787_v4, %v683_v20  ;;  %v695_v28 = vadd.f32 %v691_v21, %v1056_v24 }
 0x1cc   :  { %704 = vst [vmem:[%s1215_s4 + $0x10] sm:$0xff] %v700_v22  ;;  %v697_v23 = vadd.f32 %v693_v27, %v1066_v26  ;;  %v699_v29 = vmax.f32 %v695_v28, 0.0 }
 0x1ce   :  { %v701_v30 = vmax.f32 %v697_v23, 0.0  ;;  %703 = vst [vmem:[%s1215_s4 + $0x8] sm:$0xff] %v699_v29 }
 0x1d0   :  { %705 = vst [vmem:[%s1215_s4 + $0x18] sm:$0xff] %v701_v30 }

</bundles_post_ra>
